<compile_context>
chip_gen: v7x
topology: tpu7x:2x2x1
jax: 0.10.0
libtpu: 0.0.40
codegen_flags: <defaults>
</compile_context>

<pallas_src>
import functools

import jax
import jax.numpy as jnp
import numpy as np
from jax.experimental import pallas as pl
from jax.experimental.pallas import tpu as pltpu

LANE = 128
_TILE_CAP = 8192          # lane-tile upper bound (per perf feedback: 4096-8192)
_VMEM_BUDGET = 24 << 20   # keep double-buffered footprint under every gen's scoped VMEM
_MIN_STEPS = 4            # aim for >= 4 pipelined grid steps along the lane axis


# ------------------------------ Pallas kernel --------------------------------
def _conv1x1_kernel(x_ref, w_ref, b_ref, o_ref):
    """Pointwise (kernel-size-1) Conv1d tile: one MXU matmul + bias add.

    x_ref: [Cin, tile]    activations, lane-dense on the time(/batch*time) axis
    w_ref: [CoutF, Cin]   pre-normalized weight (weight_norm applied in wrapper)
    b_ref: [CoutF, 1]     bias
    o_ref: [CoutF, tile]
    """
    y = jnp.dot(w_ref[...], x_ref[...], preferred_element_type=jnp.float32)
    o_ref[...] = (y + b_ref[...]).astype(o_ref.dtype)


# ------------------------------ tiling helpers --------------------------------
def _choose_lane_tile(n, cin, coutf, dbytes):
    """Largest 128-multiple lane tile within cap/VMEM budget, keeping >= ~4 steps."""
    n_units = max(pl.cdiv(n, LANE), 1)                    # n in units of 128 lanes
    per_lane = 2 * (cin + coutf) * dbytes                 # double-buffered in+out bytes/lane
    cap_units = max(1, min(_TILE_CAP // LANE, _VMEM_BUDGET // (per_lane * LANE)))
    step_units = max(1, n_units // _MIN_STEPS)            # keep the pipeline deep
    # TODO(synk): if CoutF is so large that even a 128-lane tile blows the VMEM
    # budget, the output channel axis would also need tiling (not needed here).
    return LANE * max(1, min(n_units, cap_units, step_units))


def _vmem_limit(cin, coutf, tile, dbytes):
    foot = 2 * (cin + coutf) * tile * dbytes              # double-buffered x / out blocks
    foot += 2 * (coutf * cin + coutf) * 4                 # resident weight + bias
    return int(max(foot + (4 << 20), 16 << 20))           # never below v5e's 16 MiB default


# ------------------------------ jitted wrapper --------------------------------
@functools.partial(jax.jit, static_argnames=("freq_dim",))
def conv1d_to_2d(x, v, g, b, *, freq_dim):
    """Conv1DTo2D forward.

    x: [B, Cin, T]; v: [CoutF, Cin] (weight_norm direction, K=1 squeezed);
    g, b: [CoutF].  Returns [B, CoutF // freq_dim, freq_dim, T].
    """
    B, Cin, T = x.shape
    CoutF = v.shape[0]
    out_dtype = x.dtype
    dbytes = jnp.dtype(out_dtype).itemsize

    # weight_norm (dim=0): hoisted out of the kernel; single fused scale vector.
    v32 = v.astype(jnp.float32)
    scale = g.astype(jnp.float32).reshape(CoutF, 1) * jax.lax.rsqrt(
        jnp.sum(v32 * v32, axis=1, keepdims=True))
    w = scale * v32                                        # [CoutF, Cin], f32
    bias = b.reshape(CoutF, 1).astype(jnp.float32)

    if T >= LANE:
        # ----- primary path: no wrapper transposes, output written as [B,CoutF,T]
        tile = _choose_lane_tile(T, Cin, CoutF, dbytes)
        T_pad = pl.cdiv(T, tile) * tile
        xp = x if T_pad == T else jnp.pad(x, ((0, 0), (0, 0), (0, T_pad - T)))
        y = pl.pallas_call(
            _conv1x1_kernel,
            grid=(B, T_pad // tile),
            in_specs=[
                pl.BlockSpec((pl.Squeezed(), Cin, tile), lambda i, j: (i, 0, j)),
                pl.BlockSpec((CoutF, Cin), lambda i, j: (0, 0)),
                pl.BlockSpec((CoutF, 1), lambda i, j: (0, 0)),
            ],
            out_specs=pl.BlockSpec((pl.Squeezed(), CoutF, tile),
                                   lambda i, j: (i, 0, j)),
            out_shape=jax.ShapeDtypeStruct((B, CoutF, T_pad), out_dtype),
            compiler_params=pltpu.CompilerParams(
                dimension_semantics=("parallel", "parallel"),
                vmem_limit_bytes=_vmem_limit(Cin, CoutF, tile, dbytes)),
            cost_estimate=pl.CostEstimate(
                flops=2 * B * CoutF * Cin * T_pad,
                bytes_accessed=(Cin + CoutF) * B * T_pad * dbytes + CoutF * Cin * 4,
                transcendentals=0),
        )(xp, w, bias)
        if T_pad != T:
            y = y[:, :, :T]
    else:
        # ----- small-T fallback: fold batch+time onto the 128-lane axis (padded)
        BT = B * T
        tile = _choose_lane_tile(BT, Cin, CoutF, dbytes)
        BT_pad = pl.cdiv(BT, tile) * tile
        xt = jnp.transpose(x, (1, 0, 2)).reshape(Cin, BT)
        if BT_pad != BT:
            xt = jnp.pad(xt, ((0, 0), (0, BT_pad - BT)))
        y = pl.pallas_call(
            _conv1x1_kernel,
            grid=(BT_pad // tile,),
            in_specs=[
                pl.BlockSpec((Cin, tile), lambda j: (0, j)),
                pl.BlockSpec((CoutF, Cin), lambda j: (0, 0)),
                pl.BlockSpec((CoutF, 1), lambda j: (0, 0)),
            ],
            out_specs=pl.BlockSpec((CoutF, tile), lambda j: (0, j)),
            out_shape=jax.ShapeDtypeStruct((CoutF, BT_pad), out_dtype),
            compiler_params=pltpu.CompilerParams(
                dimension_semantics=("parallel",),
                vmem_limit_bytes=_vmem_limit(Cin, CoutF, tile, dbytes)),
            cost_estimate=pl.CostEstimate(
                flops=2 * CoutF * Cin * BT_pad,
                bytes_accessed=(Cin + CoutF) * BT_pad * dbytes + CoutF * Cin * 4,
                transcendentals=0),
        )(xt, w, bias)
        y = y[:, :BT].reshape(CoutF, B, T).transpose(1, 0, 2)

    # [B, CoutF, T] -> [B, C, freq_dim, T]   (free row-major split, matches .view)
    return y.reshape(B, CoutF // freq_dim, freq_dim, T)


# --------------------------------- reference ----------------------------------
def _numpy_ref(x, v, g, b, freq_dim):
    xn, vn, gn, bn = (np.asarray(a, dtype=np.float32) for a in (x, v, g, b))
    wn = gn[:, None] * vn / np.linalg.norm(vn, axis=1, keepdims=True)
    y = np.einsum("oc,bct->bot", wn, xn) + bn[None, :, None]
    B, CF, T = y.shape
    return y.reshape(B, CF // freq_dim, freq_dim, T)


# ----------------------------------- main --------------------------------------
if __name__ == "__main__":
    key = jax.random.PRNGKey(0)
    kx, kv, kg, kb, kx2 = jax.random.split(key, 5)

    B, IN_CH, OUT_CH, FREQ_DIM = 2, 32, 4, 32
    COUTF = OUT_CH * FREQ_DIM            # 128

    v = jax.random.normal(kv, (COUTF, IN_CH), dtype=jnp.float32)
    # weight_norm params: g initialized near ||v|| (PyTorch init) + jitter
    g = jnp.linalg.norm(v, axis=1) * (1.0 + 0.1 * jax.random.normal(kg, (COUTF,)))
    b = 0.01 * jax.random.normal(kb, (COUTF,), dtype=jnp.float32)

    # ---- small-T fallback path (toy shape from the module) ----
    T1 = 16
    x1 = jax.random.normal(kx, (B, IN_CH, T1), dtype=jnp.float32)
    out1 = jax.block_until_ready(conv1d_to_2d(x1, v, g, b, freq_dim=FREQ_DIM))
    assert out1.shape == (B, OUT_CH, FREQ_DIM, T1), out1.shape
    assert bool(jnp.all(jnp.isfinite(out1)))
    np.testing.assert_allclose(np.asarray(out1), _numpy_ref(x1, v, g, b, FREQ_DIM),
                               rtol=5e-2, atol=5e-2)

    # ---- primary (no-transpose, batched-grid) path ----
    T2 = 256
    x2 = jax.random.normal(kx2, (B, IN_CH, T2), dtype=jnp.float32)
    out2 = jax.block_until_ready(conv1d_to_2d(x2, v, g, b, freq_dim=FREQ_DIM))
    assert out2.shape == (B, OUT_CH, FREQ_DIM, T2), out2.shape
    assert bool(jnp.all(jnp.isfinite(out2)))
    np.testing.assert_allclose(np.asarray(out2), _numpy_ref(x2, v, g, b, FREQ_DIM),
                               rtol=5e-2, atol=5e-2)

    print("KERNEL_OK")
</pallas_src>

<mosaic_0001>
module attributes {stable_mosaic.version = 11 : i64} {
  func.func @_conv1x1_kernel(%arg0: i32, %arg1: memref<32x128xf32, #tpu.memory_space<vmem>>, %arg2: memref<128x32xf32, #tpu.memory_space<vmem>>, %arg3: memref<128x1xf32, #tpu.memory_space<vmem>>, %arg4: memref<128x128xf32, #tpu.memory_space<vmem>>) attributes {dimension_semantics = [#tpu.dimension_semantics<parallel>], iteration_bounds = array<i64: 1>, scalar_prefetch = 0 : i64, scratch_operands = 0 : i64, tpu.core_type = #tpu.core_type<tc>, window_params = [{transform_indices = @transform_0, window_bounds = array<i64: 32, 128>}, {pipeline_mode = #tpu.pipeline_mode<synchronous>, transform_indices = @transform_1, window_bounds = array<i64: 128, 32>}, {pipeline_mode = #tpu.pipeline_mode<synchronous>, transform_indices = @transform_2, window_bounds = array<i64: 128, 1>}, {transform_indices = @transform_3, window_bounds = array<i64: 128, 128>}]} {
    %c0 = arith.constant 0 : index
    %c0_0 = arith.constant 0 : index
    %0 = vector.load %arg2[%c0, %c0_0] : memref<128x32xf32, #tpu.memory_space<vmem>>, vector<128x32xf32>
    %c0_1 = arith.constant 0 : index
    %c0_2 = arith.constant 0 : index
    %1 = vector.load %arg1[%c0_1, %c0_2] : memref<32x128xf32, #tpu.memory_space<vmem>>, vector<32x128xf32>
    %cst = arith.constant dense<0.000000e+00> : vector<128x128xf32>
    %2 = tpu.matmul %0, %1, %cst {dimension_numbers = #tpu.dot_dimension_numbers<[1], [0], [0], [1], [0, 0, 1, 1], [], []>} : vector<128x32xf32>, vector<32x128xf32>, vector<128x128xf32> -> vector<128x128xf32>
    %c0_3 = arith.constant 0 : index
    %c0_4 = arith.constant 0 : index
    %3 = vector.load %arg3[%c0_3, %c0_4] : memref<128x1xf32, #tpu.memory_space<vmem>>, vector<128x1xf32>
    %4 = vector.broadcast %3 : vector<128x1xf32> to vector<128x128xf32>
    %5 = arith.addf %2, %4 : vector<128x128xf32>
    %c0_5 = arith.constant 0 : index
    %c0_6 = arith.constant 0 : index
    %6 = vector.load %arg4[%c0_5, %c0_6] : memref<128x128xf32, #tpu.memory_space<vmem>>, vector<128x128xf32>
    tpu.vector_store %arg4[%c0_5, %c0_6], %5 {strides = array<i32>} : memref<128x128xf32, #tpu.memory_space<vmem>>, vector<128x128xf32>,
    return
  }
  func.func @transform_0(%arg0: i32) -> (i32, i32) {
    %c0_i32 = arith.constant 0 : i32
    %c0_i32_0 = arith.constant 0 : i32
    return %c0_i32, %arg0 : i32, i32
  }
  func.func @transform_1(%arg0: i32) -> (i32, i32) {
    %c0_i32 = arith.constant 0 : i32
    %c0_i32_0 = arith.constant 0 : i32
    %c0_i32_1 = arith.constant 0 : i32
    return %c0_i32, %c0_i32_0 : i32, i32
  }
  func.func @transform_2(%arg0: i32) -> (i32, i32) {
    %c0_i32 = arith.constant 0 : i32
    %c0_i32_0 = arith.constant 0 : i32
    %c0_i32_1 = arith.constant 0 : i32
    return %c0_i32, %c0_i32_0 : i32, i32
  }
  func.func @transform_3(%arg0: i32) -> (i32, i32) {
    %c0_i32 = arith.constant 0 : i32
    %c0_i32_0 = arith.constant 0 : i32
    return %c0_i32, %arg0 : i32, i32
  }
}

</mosaic_0001>

<bundles_post_ra>
// kernel: conv1d_to_2d.1
= control target key start
LH: loop header
LB: loop body
LE: loop exit
PB: predicated region body
PF: predicated region fallthrough
CT: control target
= control target key end

     0   :  { %vm130_vm0 = vcmask 261120   ;;  %v427_v3 = vmov 0   ;;  %s620_s0 = inlined_call_operand.vmem [shape: f32[32,128], index: 0, kind: input, shape index: {}]   ;;  %s621_s1 = inlined_call_operand.vmem [shape: f32[128,32], index: 1, kind: input, shape index: {}]   ;;  %s622_s2 = inlined_call_operand.vmem [shape: f32[128,1], index: 2, kind: input, shape index: {}]   ;;  %s623_s3 = inlined_call_operand.vmem [shape: f32[128,128], index: 3, kind: output, shape index: {}]  }
   0x1   :  { %v30_v0 = vld [vmem:[%s620_s0] sm:$0xff]  ;;  %v31_v1 = vld [vmem:[%s620_s0 + $0x8] sm:$0xff]  ;;  %v32_v2 = vld [vmem:[%s620_s0 + $0x10] sm:$0xff]  ;;  %426 = vset.pattern.permute.xlu1 %v427_v3  ;;  %425 = vset.pattern.permute.xlu0 %v427_v3 }
   0x2   :  { %v412_v4 = vpack.c.bf16 %v31_v1, %v30_v0  ;;  %v33_v5 = vld [vmem:[%s620_s0 + $0x18] sm:$0xff]  ;;  %v14_v6 = vld [vmem:[%s621_s1] sm:$0xff]  ;;  %v36_v9 = vld [vmem:[%s622_s2 + $0x10] sm:$0xff] }
   0x3   :  { %v22_v7 = vld [vmem:[%s621_s1 + $0x40] sm:$0xff]  ;;  %v416_v8 = vpack.c.bf16 %v33_v5, %v32_v2  ;;  %388 = vmatprep.mubr.msk.f32.mxu0 %vm130_vm0, %v14_v6  ;;  %62 = vperm.xlu1 %426, %v36_v9   ;;  %v15_v11 = vld [vmem:[%s621_s1 + $0x8] sm:$0xff]  ;;  %v16_v13 = vld [vmem:[%s621_s1 + $0x10] sm:$0xff] }
   0x4   :  { %400 = vmatprep.mubr.msk.f32.mxu1 %vm130_vm0, %v22_v7  ;;  %413 = vmatprep.subr.bf16.mxu0 %v412_v4  ;;  %v34_v10 = vld [vmem:[%s622_s2] sm:$0xff]  ;;  %v23_v12 = vld [vmem:[%s621_s1 + $0x48] sm:$0xff]  ;;  %v24_v14 = vld [vmem:[%s621_s1 + $0x50] sm:$0xff] }
   0x5   :  { %420 = vmatprep.subr.bf16.mxu1 %v412_v4  ;;  %415 = vmatpush3.bf16.msra.mxu0 %v412_v4  ;;  %v37_v15 = vld [vmem:[%s622_s2 + $0x18] sm:$0xff]  ;;  %v35_v16 = vld [vmem:[%s622_s2 + $0x8] sm:$0xff]  ;;  %v18_v19 = vld [vmem:[%s621_s1 + $0x20] sm:$0xff] }
   0x6   :  { %422 = vmatpush3.bf16.msra.mxu1 %v412_v4  ;;  %417 = vmatprep.subr.bf16.mxu0 %v416_v8  ;;  %v17_v17 = vld [vmem:[%s621_s1 + $0x18] sm:$0xff]  ;;  %v26_v20 = vld [vmem:[%s621_s1 + $0x60] sm:$0xff]  ;;  %v39_v21 = vld [vmem:[%s622_s2 + $0x28] sm:$0xff] }
   0x7   :  { %421 = vmatprep.subr.bf16.mxu1 %v416_v8  ;;  %52 = vperm.xlu0 %425, %v34_v10   ;;  %v25_v18 = vld [vmem:[%s621_s1 + $0x58] sm:$0xff]  ;;  %v38_v22 = vld [vmem:[%s622_s2 + $0x20] sm:$0xff]  ;;  %v19_v23 = vld [vmem:[%s621_s1 + $0x28] sm:$0xff] }
   0x8   :  { %67 = vperm.xlu1 %426, %v37_v15   ;;  %v27_v24 = vld [vmem:[%s621_s1 + $0x68] sm:$0xff]  ;;  %v20_v25 = vld [vmem:[%s621_s1 + $0x30] sm:$0xff]  ;;  %v41_v27 = vld [vmem:[%s622_s2 + $0x38] sm:$0xff] }
   0x9   :  { %419 = vmatpush3.bf16.msra.mxu0 %v416_v8  ;;  %v28_v26 = vld [vmem:[%s621_s1 + $0x70] sm:$0xff]  ;;  %v21_v29 = vld [vmem:[%s621_s1 + $0x38] sm:$0xff]  ;;  %v43_v31 = vld [vmem:[%s622_s2 + $0x48] sm:$0xff] }
   0xa   :  { %423 = vmatpush3.bf16.msra.mxu1 %v416_v8  ;;  %v40_v28 = vld [vmem:[%s622_s2 + $0x30] sm:$0xff]  ;;  %v29_v30 = vld [vmem:[%s621_s1 + $0x78] sm:$0xff]  ;;  %v42_v32 = vld [vmem:[%s622_s2 + $0x40] sm:$0xff] }
   0xb   :  { %57 = vperm.xlu0 %425, %v35_v16   ;;  %v45_v33 = vld [vmem:[%s622_s2 + $0x58] sm:$0xff]  ;;  %v44_v34 = vld [vmem:[%s622_s2 + $0x50] sm:$0xff]  ;;  %v47_v35 = vld [vmem:[%s622_s2 + $0x68] sm:$0xff] }
   0xc   :  { %389 = vmatmul.mubr.msk.f32.vlgmr.msra.gmra.mrb[0].mxu0 %vm130_vm0, %v15_v11  ;;  %77 = vperm.xlu1 %426, %v39_v21   ;;  %v46_v36 = vld [vmem:[%s622_s2 + $0x60] sm:$0xff]  ;;  %v49_v37 = vld [vmem:[%s622_s2 + $0x78] sm:$0xff]  ;;  %v48_v38 = vld [vmem:[%s622_s2 + $0x70] sm:$0xff] }
   0xd   :  { %401 = vmatmul.mubr.msk.f32.vlgmr.msra.gmra.mrb[0].mxu1 %vm130_vm0, %v23_v12  ;;  %391 = vmatprep.mubr.msk.f32.mxu0 %vm130_vm0, %v16_v13 }
   0xe   :  { %403 = vmatprep.mubr.msk.f32.mxu1 %vm130_vm0, %v24_v14 }
   0xf   :  { %72 = vperm.xlu0 %425, %v38_v22  }
  0x10   :  { %392 = vmatmul.mubr.msk.f32.gmra.mrb[2].mxu0 %vm130_vm0, %v17_v17  ;;  %87 = vperm.xlu1 %426, %v41_v27  }
  0x11   :  { %404 = vmatmul.mubr.msk.f32.gmra.mrb[2].mxu1 %vm130_vm0, %v25_v18  ;;  %394 = vmatprep.mubr.msk.f32.mxu0 %vm130_vm0, %v18_v19 }
  0x12   :  { %406 = vmatprep.mubr.msk.f32.mxu1 %vm130_vm0, %v26_v20 }
  0x13   :  { %82 = vperm.xlu0 %425, %v40_v28  }
  0x14   :  { %395 = vmatmul.mubr.msk.f32.gmra.mrb[4].mxu0 %vm130_vm0, %v19_v23  ;;  %97 = vperm.xlu1 %426, %v43_v31  }
  0x15   :  { %407 = vmatmul.mubr.msk.f32.gmra.mrb[4].mxu1 %vm130_vm0, %v27_v24  ;;  %397 = vmatprep.mubr.msk.f32.mxu0 %vm130_vm0, %v20_v25 }
  0x16   :  { %409 = vmatprep.mubr.msk.f32.mxu1 %vm130_vm0, %v28_v26 }
  0x17   :  { %92 = vperm.xlu0 %425, %v42_v32  }
  0x18   :  { %398 = vmatmul.mubr.msk.f32.gmra.mrb[6].mxu0 %vm130_vm0, %v21_v29  ;;  %107 = vperm.xlu1 %426, %v45_v33  }
  0x19   :  { %410 = vmatmul.mubr.msk.f32.gmra.mrb[6].mxu1 %vm130_vm0, %v29_v30 }
  0x1b   :  { %102 = vperm.xlu0 %425, %v44_v34  }
  0x1c   :  { %117 = vperm.xlu1 %426, %v47_v35  }
  0x1f   :  { %112 = vperm.xlu0 %425, %v46_v36  }
  0x20   :  { %127 = vperm.xlu1 %426, %v49_v37  }
  0x23   :  { %122 = vperm.xlu0 %425, %v48_v38  }
  0x82   :  { %v63_v39 = vpop.permute.xlu1 %62 }
  0x86   :  { %v53_v40 = vpop.permute.xlu0 %52 }
  0x87   :  { %v68_v41 = vpop.permute.xlu1 %67 }
  0x8a   :  { %v58_v42 = vpop.permute.xlu0 %57 }
  0x8b   :  { %v78_v43 = vpop.permute.xlu1 %77 }
  0x8e   :  { %v73_v44 = vpop.permute.xlu0 %72 }
  0x8f   :  { %v88_v45 = vpop.permute.xlu1 %87 }
  0x92   :  { %v83_v46 = vpop.permute.xlu0 %82 }
  0x93   :  { %v98_v47 = vpop.permute.xlu1 %97 }
  0x96   :  { %v93_v48 = vpop.permute.xlu0 %92 }
  0x97   :  { %v108_v49 = vpop.permute.xlu1 %107 }
  0x9a   :  { %v103_v50 = vpop.permute.xlu0 %102 }
  0x9b   :  { %v118_v59 = vpop.permute.xlu1 %117 }
  0x9e   :  { %v113_v60 = vpop.permute.xlu0 %112 }
  0x9f   :  { %v128_v13 = vpop.permute.xlu1 %127 }
  0xa2   :  { %v123_v14 = vpop.permute.xlu0 %122 }
  0xdf   :  { %v390_v51 = vpop.f32.mrb[0].mxu0 }
  0xe0   :  { %v402_v52 = vpop.f32.mrb[0].mxu1  ;;  %v251_v53 = vadd.f32 %v390_v51, %v58_v42  ;;  %v245_v55 = vpop.f32.mrb[1].mxu0 }
  0xe1   :  { %v291_v54 = vadd.f32 %v402_v52, %v98_v47  ;;  %v285_v56 = vpop.f32.mrb[1].mxu1  ;;  %v246_v57 = vadd.f32 %v245_v55, %v53_v40 }
  0xe2   :  { %v286_v58 = vadd.f32 %v285_v56, %v93_v48  ;;  %325 = vst [vmem:[%s623_s3 + $0x8] sm:$0xff] %v251_v53 }
  0xe3   :  { %333 = vst [vmem:[%s623_s3 + $0x48] sm:$0xff] %v291_v54  ;;  %324 = vst [vmem:[%s623_s3] sm:$0xff] %v246_v57  ;;  %v393_v61 = vpop.f32.mrb[2].mxu0 }
  0xe4   :  { %332 = vst [vmem:[%s623_s3 + $0x40] sm:$0xff] %v286_v58  ;;  %v405_v62 = vpop.f32.mrb[2].mxu1  ;;  %v261_v63 = vadd.f32 %v393_v61, %v68_v41  ;;  %v255_v1 = vpop.f32.mrb[3].mxu0 }
  0xe5   :  { %v301_v0 = vadd.f32 %v405_v62, %v108_v49  ;;  %v295_v2 = vpop.f32.mrb[3].mxu1  ;;  %v256_v3 = vadd.f32 %v255_v1, %v63_v39 }
  0xe6   :  { %v296_v4 = vadd.f32 %v295_v2, %v103_v50  ;;  %327 = vst [vmem:[%s623_s3 + $0x18] sm:$0xff] %v261_v63 }
  0xe7   :  { %335 = vst [vmem:[%s623_s3 + $0x58] sm:$0xff] %v301_v0  ;;  %326 = vst [vmem:[%s623_s3 + $0x10] sm:$0xff] %v256_v3  ;;  %v396_v5 = vpop.f32.mrb[4].mxu0 }
  0xe8   :  { %334 = vst [vmem:[%s623_s3 + $0x50] sm:$0xff] %v296_v4  ;;  %v408_v6 = vpop.f32.mrb[4].mxu1  ;;  %v271_v7 = vadd.f32 %v396_v5, %v78_v43  ;;  %v265_v9 = vpop.f32.mrb[5].mxu0 }
  0xe9   :  { %v311_v8 = vadd.f32 %v408_v6, %v118_v59  ;;  %v305_v10 = vpop.f32.mrb[5].mxu1  ;;  %v266_v11 = vadd.f32 %v265_v9, %v73_v44 }
  0xea   :  { %v306_v12 = vadd.f32 %v305_v10, %v113_v60  ;;  %329 = vst [vmem:[%s623_s3 + $0x28] sm:$0xff] %v271_v7 }
  0xeb   :  { %337 = vst [vmem:[%s623_s3 + $0x68] sm:$0xff] %v311_v8  ;;  %328 = vst [vmem:[%s623_s3 + $0x20] sm:$0xff] %v266_v11  ;;  %v399_v15 = vpop.f32.mrb[6].mxu0 }
  0xec   :  { %336 = vst [vmem:[%s623_s3 + $0x60] sm:$0xff] %v306_v12  ;;  %v411_v16 = vpop.f32.mrb[6].mxu1  ;;  %v281_v17 = vadd.f32 %v399_v15, %v88_v45  ;;  %v275_v19 = vpop.f32.mrb[7].mxu0 }
  0xed   :  { %v321_v18 = vadd.f32 %v411_v16, %v128_v13  ;;  %v315_v20 = vpop.f32.mrb[7].mxu1  ;;  %v276_v21 = vadd.f32 %v275_v19, %v83_v46 }
  0xee   :  { %v316_v22 = vadd.f32 %v315_v20, %v123_v14  ;;  %331 = vst [vmem:[%s623_s3 + $0x38] sm:$0xff] %v281_v17 }
  0xef   :  { %339 = vst [vmem:[%s623_s3 + $0x78] sm:$0xff] %v321_v18  ;;  %330 = vst [vmem:[%s623_s3 + $0x30] sm:$0xff] %v276_v21 }
  0xf0   :  { %338 = vst [vmem:[%s623_s3 + $0x70] sm:$0xff] %v316_v22 }

</bundles_post_ra>
